<compile_context>
chip_gen: v5e
topology: v5e:2x2
jax: 0.10.0
libtpu: 0.0.40
codegen_flags: <defaults>
</compile_context>

<pallas_src>
import jax
import jax.numpy as jnp
from jax.experimental import pallas as pl
from jax.experimental.pallas import tpu as pltpu  # noqa: F401  (TPU backend)

F32 = jnp.float32
NUM_CLASSES = 2
OUT_PAD = 128      # lane-dense padded classifier width (sliced to NUM_CLASSES outside)
FEAT = 400         # per-modality vision-encoder feature width (800 = 2 * 400 total)


# ----------------------------------------------------------------------------
# Fused Pallas kernel: cat(mri, pet) -> Linear -> ReLU -> Linear -> ReLU -> Linear
# ----------------------------------------------------------------------------

def _mlp_head_kernel(mri_ref, pet_ref,
                     w1a_ref, w1b_ref, b1_ref,
                     w2_ref, b2_ref,
                     w3_ref, b3_ref,
                     o_ref):
    # cat(mri, pet, dim=1) @ W1  ==  mri @ W1[:400] + pet @ W1[400:]
    h1 = (jnp.dot(mri_ref[...], w1a_ref[...], preferred_element_type=jnp.float32)
          + jnp.dot(pet_ref[...], w1b_ref[...], preferred_element_type=jnp.float32)
          + b1_ref[...])
    h1 = jnp.maximum(h1, 0.0)                                            # ReLU
    h2 = jnp.maximum(
        jnp.dot(h1, w2_ref[...], preferred_element_type=jnp.float32) + b2_ref[...],
        0.0)                                                             # ReLU
    o_ref[...] = (jnp.dot(h2, w3_ref[...], preferred_element_type=jnp.float32)
                  + b3_ref[...])                                         # [B, 128]


def resnet_mri_pet_head(params, mri_feature, pet_feature):
    """mri_feature, pet_feature: [B, 400] -> logits [B, NUM_CLASSES]."""
    B = mri_feature.shape[0]
    out_pad = pl.pallas_call(
        _mlp_head_kernel,
        out_shape=jax.ShapeDtypeStruct((B, OUT_PAD), F32),
    )(mri_feature.astype(F32), pet_feature.astype(F32),
      params["w1a"], params["w1b"], params["b1"],
      params["w2"], params["b2"],
      params["w3"], params["b3"])
    return out_pad[:, :NUM_CLASSES]


# ----------------------------------------------------------------------------
# Parameter init (deterministic, PyTorch-Linear-style uniform init),
# pre-transposed / split / padded once so the forward pass has no layout work.
# ----------------------------------------------------------------------------

def _lin_init(key, dout, din):
    bound = 1.0 / (din ** 0.5)
    kw, kb = jax.random.split(key)
    w = jax.random.uniform(kw, (dout, din), F32, -bound, bound)
    b = jax.random.uniform(kb, (dout,), F32, -bound, bound)
    return w, b


def init_params(key, num_classes=NUM_CLASSES):
    k1, k2, k3 = jax.random.split(key, 3)
    w1, b1 = _lin_init(k1, 256, 2 * FEAT)        # nn.Linear(800, 256)
    w2, b2 = _lin_init(k2, 64, 256)              # nn.Linear(256, 64)
    w3, b3 = _lin_init(k3, num_classes, 64)      # nn.Linear(64, num_classes)

    w1t = jnp.transpose(w1)                                        # [800, 256]
    w3t_pad = jnp.zeros((64, OUT_PAD), F32).at[:, :num_classes].set(jnp.transpose(w3))
    b3_pad = jnp.zeros((1, OUT_PAD), F32).at[:, :num_classes].set(b3[None, :])

    return {
        "w1a": w1t[:FEAT],                 # MRI half of W1, [400, 256]
        "w1b": w1t[FEAT:],                 # PET half of W1, [400, 256]
        "b1": b1.reshape(1, 256),
        "w2": jnp.transpose(w2),           # [256, 64]
        "b2": b2.reshape(1, 64),
        "w3": w3t_pad,                     # [64, 128] (zero-padded lanes)
        "b3": b3_pad,                      # [1, 128]
    }


# ----------------------------------------------------------------------------
# Forward pass of ResnetMriPet
# ----------------------------------------------------------------------------

def resnet_mri_pet_forward(params, mri_feature, pet_feature):
    """
    mri_feature: [B, 400]  (output of MriExtraction on mri_pet[:, 0:1])
    pet_feature: [B, 400]  (output of PetExtraction on mri_pet[:, 1:2])
    returns logits [B, NUM_CLASSES]
    """
    # TODO(synk): get_pretrained_vision_encoder (pretrained 3-D ResNet over
    # [B,1,96,128,96] per modality) is not defined in the reference source;
    # its 400-d per-modality feature outputs are taken directly as kernel
    # inputs (the channel split of mri_pet happens before those encoders).
    return resnet_mri_pet_head(params, mri_feature, pet_feature)


# ----------------------------------------------------------------------------

if __name__ == "__main__":
    key = jax.random.PRNGKey(0)
    kp, k1, k2 = jax.random.split(key, 3)

    params = init_params(kp)

    B = 2
    mri_feat = jax.random.normal(k1, (B, FEAT), F32)
    pet_feat = jax.random.normal(k2, (B, FEAT), F32)

    logits = resnet_mri_pet_forward(params, mri_feat, pet_feat)
    jax.block_until_ready(logits)
    assert logits.shape == (B, NUM_CLASSES)

    # Pure-JAX reference of the fc head for a correctness check.
    x = jnp.concatenate([mri_feat, pet_feat], axis=1)                    # [B, 800]
    w1_full = jnp.concatenate([params["w1a"], params["w1b"]], axis=0)
    h = jnp.maximum(x @ w1_full + params["b1"], 0.0)
    h = jnp.maximum(h @ params["w2"] + params["b2"], 0.0)
    ref = (h @ params["w3"] + params["b3"])[:, :NUM_CLASSES]
    assert jnp.allclose(logits, ref, atol=1e-4, rtol=1e-4)

    print("KERNEL_OK")
</pallas_src>

<mosaic_0001>
module attributes {stable_mosaic.version = 11 : i64} {
  func.func @_mlp_head_kernel(%arg0: memref<2x400xf32, #tpu.memory_space<vmem>>, %arg1: memref<2x400xf32, #tpu.memory_space<vmem>>, %arg2: memref<400x256xf32, #tpu.memory_space<vmem>>, %arg3: memref<400x256xf32, #tpu.memory_space<vmem>>, %arg4: memref<1x256xf32, #tpu.memory_space<vmem>>, %arg5: memref<256x64xf32, #tpu.memory_space<vmem>>, %arg6: memref<1x64xf32, #tpu.memory_space<vmem>>, %arg7: memref<64x128xf32, #tpu.memory_space<vmem>>, %arg8: memref<1x128xf32, #tpu.memory_space<vmem>>, %arg9: memref<2x128xf32, #tpu.memory_space<vmem>>) attributes {dimension_semantics = [], scalar_prefetch = 0 : i64, scratch_operands = 0 : i64, tpu.core_type = #tpu.core_type<tc>} {
    %c0 = arith.constant 0 : index
    %c0_0 = arith.constant 0 : index
    %0 = vector.load %arg0[%c0, %c0_0] : memref<2x400xf32, #tpu.memory_space<vmem>>, vector<2x400xf32>
    %c0_1 = arith.constant 0 : index
    %c0_2 = arith.constant 0 : index
    %1 = vector.load %arg2[%c0_1, %c0_2] : memref<400x256xf32, #tpu.memory_space<vmem>>, vector<400x256xf32>
    %cst = arith.constant dense<0.000000e+00> : vector<2x256xf32>
    %2 = tpu.matmul %0, %1, %cst {dimension_numbers = #tpu.dot_dimension_numbers<[1], [0], [0], [1], [0, 0, 1, 1], [], []>} : vector<2x400xf32>, vector<400x256xf32>, vector<2x256xf32> -> vector<2x256xf32>
    %c0_3 = arith.constant 0 : index
    %c0_4 = arith.constant 0 : index
    %3 = vector.load %arg1[%c0_3, %c0_4] : memref<2x400xf32, #tpu.memory_space<vmem>>, vector<2x400xf32>
    %c0_5 = arith.constant 0 : index
    %c0_6 = arith.constant 0 : index
    %4 = vector.load %arg3[%c0_5, %c0_6] : memref<400x256xf32, #tpu.memory_space<vmem>>, vector<400x256xf32>
    %cst_7 = arith.constant dense<0.000000e+00> : vector<2x256xf32>
    %5 = tpu.matmul %3, %4, %cst_7 {dimension_numbers = #tpu.dot_dimension_numbers<[1], [0], [0], [1], [0, 0, 1, 1], [], []>} : vector<2x400xf32>, vector<400x256xf32>, vector<2x256xf32> -> vector<2x256xf32>
    %6 = arith.addf %2, %5 : vector<2x256xf32>
    %c0_8 = arith.constant 0 : index
    %c0_9 = arith.constant 0 : index
    %7 = vector.load %arg4[%c0_8, %c0_9] : memref<1x256xf32, #tpu.memory_space<vmem>>, vector<1x256xf32>
    %8 = vector.broadcast %7 : vector<1x256xf32> to vector<2x256xf32>
    %9 = arith.addf %6, %8 : vector<2x256xf32>
    %cst_10 = arith.constant 0.000000e+00 : f32
    %10 = vector.broadcast %cst_10 : f32 to vector<2x256xf32>
    %11 = arith.maximumf %9, %10 : vector<2x256xf32>
    %c0_11 = arith.constant 0 : index
    %c0_12 = arith.constant 0 : index
    %12 = vector.load %arg5[%c0_11, %c0_12] : memref<256x64xf32, #tpu.memory_space<vmem>>, vector<256x64xf32>
    %cst_13 = arith.constant dense<0.000000e+00> : vector<2x64xf32>
    %13 = tpu.matmul %11, %12, %cst_13 {dimension_numbers = #tpu.dot_dimension_numbers<[1], [0], [0], [1], [0, 0, 1, 1], [], []>} : vector<2x256xf32>, vector<256x64xf32>, vector<2x64xf32> -> vector<2x64xf32>
    %c0_14 = arith.constant 0 : index
    %c0_15 = arith.constant 0 : index
    %14 = vector.load %arg6[%c0_14, %c0_15] : memref<1x64xf32, #tpu.memory_space<vmem>>, vector<1x64xf32>
    %15 = vector.broadcast %14 : vector<1x64xf32> to vector<2x64xf32>
    %16 = arith.addf %13, %15 : vector<2x64xf32>
    %cst_16 = arith.constant 0.000000e+00 : f32
    %17 = vector.broadcast %cst_16 : f32 to vector<2x64xf32>
    %18 = arith.maximumf %16, %17 : vector<2x64xf32>
    %c0_17 = arith.constant 0 : index
    %c0_18 = arith.constant 0 : index
    %19 = vector.load %arg7[%c0_17, %c0_18] : memref<64x128xf32, #tpu.memory_space<vmem>>, vector<64x128xf32>
    %cst_19 = arith.constant dense<0.000000e+00> : vector<2x128xf32>
    %20 = tpu.matmul %18, %19, %cst_19 {dimension_numbers = #tpu.dot_dimension_numbers<[1], [0], [0], [1], [0, 0, 1, 1], [], []>} : vector<2x64xf32>, vector<64x128xf32>, vector<2x128xf32> -> vector<2x128xf32>
    %c0_20 = arith.constant 0 : index
    %c0_21 = arith.constant 0 : index
    %21 = vector.load %arg8[%c0_20, %c0_21] : memref<1x128xf32, #tpu.memory_space<vmem>>, vector<1x128xf32>
    %22 = vector.broadcast %21 : vector<1x128xf32> to vector<2x128xf32>
    %23 = arith.addf %20, %22 : vector<2x128xf32>
    %c0_22 = arith.constant 0 : index
    %c0_23 = arith.constant 0 : index
    %24 = vector.load %arg9[%c0_22, %c0_23] : memref<2x128xf32, #tpu.memory_space<vmem>>, vector<2x128xf32>
    tpu.vector_store %arg9[%c0_22, %c0_23], %23 {strides = array<i32>} : memref<2x128xf32, #tpu.memory_space<vmem>>, vector<2x128xf32>,
    return
  }
}

</mosaic_0001>

<bundles_post_ra>
// kernel: tpu_custom_call.1
= control target key start
LH: loop header
LB: loop body
LE: loop exit
PB: predicated region body
PF: predicated region fallthrough
CT: control target
= control target key end

     0   :  { %14 = vsyncpa [#allocation3], 0  ;;  %s1069_s0 = inlined_call_operand.vmem [shape: f32[2,400], index: 0, kind: input, shape index: {}]   ;;  %s1070_s1 = inlined_call_operand.vmem [shape: f32[2,400], index: 1, kind: input, shape index: {}]   ;;  %s1071_s2 = inlined_call_operand.hbm [shape: f32[400,256], index: 2, kind: input, shape index: {}]   ;;  %s1072_s3 = inlined_call_operand.hbm [shape: f32[400,256], index: 3, kind: input, shape index: {}]   ;;  %s1073_s4 = inlined_call_operand.vmem [shape: f32[1,256], index: 4, kind: input, shape index: {}]   ;;  %s1074_s5 = inlined_call_operand.vmem [shape: f32[256,64], index: 5, kind: input, shape index: {}]   ;;  %s1075_s6 = inlined_call_operand.vmem [shape: f32[1,64], index: 6, kind: input, shape index: {}]   ;;  %s1076_s7 = inlined_call_operand.vmem [shape: f32[64,128], index: 7, kind: input, shape index: {}]   ;;  %s1077_s8 = inlined_call_operand.vmem [shape: f32[1,128], index: 8, kind: input, shape index: {}]   ;;  %s1078_s9 = inlined_call_operand.hbm [shape: f32[2,128], index: 9, kind: output, shape index: {}]  }
   0x1   :  { %15 = vsyncpa [#allocation6], 0 }
   0x2   :  { %16 = vsyncpa [#allocation4], 0  ;;  %s25_s11 = sshll.u32 %s1071_s2, 4  ;;  %s842_s12 = smov [#allocation2]   ;;  %s26_s11 = int_to_ptr.hbm [resolvable:$true] %s25_s11 }
   0x3   :  { %s27_s13 = sshll.u32 %s842_s12, 4  ;;  %s38_s16 = sshll.u32 %s1072_s3, 4  ;;  %s28_s13 = int_to_ptr.vmem [resolvable:$true] %s27_s13  ;;  %s39_s16 = int_to_ptr.hbm [resolvable:$true] %s38_s16 }
   0x4   :  { %s843_s17 = smov 256   ;;  %s844_s18 = smov 16  }
   0x5   :  { %33 = dma.hbm_to_vmem [thread:$0]  %s26_s11, 12800, %s28_s13, [#allocation3], %s843_s17, %s843_s17, %s844_s18  }
   0x6   :  { %s845_s19 = smov [#allocation5]  }
   0x7   :  { %s40_s20 = sshll.u32 %s845_s19, 4  ;;  %s41_s20 = int_to_ptr.vmem [resolvable:$true] %s40_s20 }
   0x8   :  { %46 = dma.hbm_to_vmem [thread:$0]  %s39_s16, 12800, %s41_s20, [#allocation6], %s843_s17, %s843_s17, %s844_s18  }
   0x9   :  { %836 = dma.done.wait [#allocation3], 12800  }
   0xa   :  { %837 = vsyncadd [#allocation3], 4294954496 }
   0xb   :  { %838 = dma.done.wait [#allocation6], 12800  }
   0xc   :  { %839 = vsyncadd [#allocation6], 4294954496  ;;  %v197_v0 = vld [vmem:[#allocation5 + $0xf0] sm:$0xff]  ;;  %v198_v2 = vld [vmem:[#allocation5 + $0xf8] sm:$0xff]  ;;  %vm276_vm0 = vcmask 130048   ;;  %vm709_vm1 = vcmask 523264  }
   0xd   :  { %v261_v1 = vld [vmem:[#allocation5 + $0x2f0] sm:$0xff]  ;;  %279 = vmatpush.msra.mxu0 %v197_v0  ;;  %v195_v3 = vld [vmem:[#allocation5 + $0xe0] sm:$0xff]  ;;  %v196_v5 = vld [vmem:[#allocation5 + $0xe8] sm:$0xff]  ;;  %359 = vmatpush.msra.mxu3 %v198_v2  ;;  %s846_s30 = smov [#allocation7]   ;;  %s741_s12 = sshll.u32 %s1078_s9, 4  ;;  %s742_s12 = int_to_ptr.hbm [resolvable:$true] %s741_s12 }
   0xe   :  { %319 = vmatpush.msra.mxu2 %v261_v1  ;;  %v259_v4 = vld [vmem:[#allocation5 + $0x2e0] sm:$0xff]  ;;  %v193_v6 = vld [vmem:[#allocation5 + $0xd0] sm:$0xff]  ;;  %v194_v9 = vld [vmem:[#allocation5 + $0xd8] sm:$0xff]  ;;  %s739_s10 = sshll.u32 %s846_s30, 4  ;;  %s740_s10 = int_to_ptr.vmem [resolvable:$true] %s739_s10 }
   0xf   :  { %v229_v7 = vld [vmem:[#allocation5 + $0x1f0] sm:$0xff]  ;;  %280 = vmatpush.msra.mxu0 %v195_v3  ;;  %v227_v10 = vld [vmem:[#allocation5 + $0x1e0] sm:$0xff]  ;;  %360 = vmatpush.msra.mxu3 %v196_v5  ;;  %v192_v13 = vld [vmem:[#allocation5 + $0xc8] sm:$0xff] }
  0x10   :  { %v257_v8 = vld [vmem:[#allocation5 + $0x2d0] sm:$0xff]  ;;  %320 = vmatpush.msra.mxu2 %v259_v4  ;;  %299 = vmatpush.msra.mxu1 %v229_v7  ;;  %v191_v11 = vld [vmem:[#allocation5 + $0xc0] sm:$0xff]  ;;  %v190_v17 = vld [vmem:[#allocation5 + $0xb8] sm:$0xff] }
  0x11   :  { %v255_v12 = vld [vmem:[#allocation5 + $0x2c0] sm:$0xff]  ;;  %281 = vmatpush.msra.mxu0 %v193_v6  ;;  %v225_v14 = vld [vmem:[#allocation5 + $0x1d0] sm:$0xff]  ;;  %361 = vmatpush.msra.mxu3 %v194_v9  ;;  %v188_v21 = vld [vmem:[#allocation5 + $0xa8] sm:$0xff] }
  0x12   :  { %321 = vmatpush.msra.mxu2 %v257_v8  ;;  %300 = vmatpush.msra.mxu1 %v227_v10  ;;  %v189_v15 = vld [vmem:[#allocation5 + $0xb0] sm:$0xff]  ;;  %v223_v18 = vld [vmem:[#allocation5 + $0x1c0] sm:$0xff]  ;;  %v186_v25 = vld [vmem:[#allocation5 + $0x98] sm:$0xff] }
  0x13   :  { %v253_v16 = vld [vmem:[#allocation5 + $0x2b0] sm:$0xff]  ;;  %282 = vmatpush.msra.mxu0 %v191_v11  ;;  %362 = vmatpush.msra.mxu3 %v192_v13  ;;  %v187_v19 = vld [vmem:[#allocation5 + $0xa0] sm:$0xff]  ;;  %v184_v29 = vld [vmem:[#allocation5 + $0x88] sm:$0xff] }
  0x14   :  { %322 = vmatpush.msra.mxu2 %v255_v12  ;;  %301 = vmatpush.msra.mxu1 %v225_v14  ;;  %v251_v20 = vld [vmem:[#allocation5 + $0x2a0] sm:$0xff]  ;;  %v221_v22 = vld [vmem:[#allocation5 + $0x1b0] sm:$0xff]  ;;  %v182_v33 = vld [vmem:[#allocation5 + $0x78] sm:$0xff] }
  0x15   :  { %283 = vmatpush.msra.mxu0 %v189_v15  ;;  %363 = vmatpush.msra.mxu3 %v190_v17  ;;  %v185_v23 = vld [vmem:[#allocation5 + $0x90] sm:$0xff]  ;;  %v219_v26 = vld [vmem:[#allocation5 + $0x1a0] sm:$0xff]  ;;  %v180_v37 = vld [vmem:[#allocation5 + $0x68] sm:$0xff] }
  0x16   :  { %323 = vmatpush.msra.mxu2 %v253_v16  ;;  %302 = vmatpush.msra.mxu1 %v223_v18  ;;  %v249_v24 = vld [vmem:[#allocation5 + $0x290] sm:$0xff]  ;;  %v183_v27 = vld [vmem:[#allocation5 + $0x80] sm:$0xff]  ;;  %v178_v41 = vld [vmem:[#allocation5 + $0x58] sm:$0xff] }
  0x17   :  { %284 = vmatpush.msra.mxu0 %v187_v19  ;;  %364 = vmatpush.msra.mxu3 %v188_v21  ;;  %v247_v28 = vld [vmem:[#allocation5 + $0x280] sm:$0xff]  ;;  %v217_v30 = vld [vmem:[#allocation5 + $0x190] sm:$0xff]  ;;  %v166_v45 = vld [vmem:[%s1070_s1] sm:$0xff] }
  0x18   :  { %324 = vmatpush.msra.mxu2 %v251_v20  ;;  %303 = vmatpush.msra.mxu1 %v221_v22  ;;  %v181_v31 = vld [vmem:[#allocation5 + $0x70] sm:$0xff]  ;;  %v215_v34 = vld [vmem:[#allocation5 + $0x180] sm:$0xff]  ;;  %v176_v46 = vld [vmem:[#allocation5 + $0x48] sm:$0xff]  ;;  %268 = vst [vmem:[#allocation1] ss:$4 sm:$0xff] %v166_v45 }
  0x19   :  { %285 = vmatpush.msra.mxu0 %v185_v23  ;;  %365 = vmatpush.msra.mxu3 %v186_v25  ;;  %v245_v32 = vld [vmem:[#allocation5 + $0x270] sm:$0xff]  ;;  %v179_v35 = vld [vmem:[#allocation5 + $0x60] sm:$0xff]  ;;  %v174_v50 = vld [vmem:[#allocation5 + $0x38] sm:$0xff] }
  0x1a   :  { %325 = vmatpush.msra.mxu2 %v249_v24  ;;  %304 = vmatpush.msra.mxu1 %v219_v26  ;;  %v243_v36 = vld [vmem:[#allocation5 + $0x260] sm:$0xff]  ;;  %v213_v38 = vld [vmem:[#allocation5 + $0x170] sm:$0xff]  ;;  %v172_v54 = vld [vmem:[#allocation5 + $0x28] sm:$0xff] }
  0x1b   :  { %286 = vmatpush.msra.mxu0 %v183_v27  ;;  %366 = vmatpush.msra.mxu3 %v184_v29  ;;  %v177_v39 = vld [vmem:[#allocation5 + $0x50] sm:$0xff]  ;;  %v211_v42 = vld [vmem:[#allocation5 + $0x160] sm:$0xff]  ;;  %v170_v58 = vld [vmem:[#allocation5 + $0x18] sm:$0xff] }
  0x1c   :  { %326 = vmatpush.msra.mxu2 %v247_v28  ;;  %305 = vmatpush.msra.mxu1 %v217_v30  ;;  %v241_v40 = vld [vmem:[#allocation5 + $0x250] sm:$0xff]  ;;  %v175_v43 = vld [vmem:[#allocation5 + $0x40] sm:$0xff]  ;;  %v168_v62 = vld [vmem:[#allocation5 + $0x8] sm:$0xff] }
  0x1d   :  { %287 = vmatpush.msra.mxu0 %v181_v31  ;;  %367 = vmatpush.msra.mxu3 %v182_v33  ;;  %v239_v44 = vld [vmem:[#allocation5 + $0x240] sm:$0xff]  ;;  %v209_v47 = vld [vmem:[#allocation5 + $0x150] sm:$0xff]  ;;  %v65_v63 = vld [vmem:[%s1069_s0] sm:$0xff] }
  0x1e   :  { %327 = vmatpush.msra.mxu2 %v245_v32  ;;  %306 = vmatpush.msra.mxu1 %v215_v34  ;;  %v173_v48 = vld [vmem:[#allocation5 + $0x30] sm:$0xff]  ;;  %v207_v51 = vld [vmem:[#allocation5 + $0x140] sm:$0xff]  ;;  %v230_v4 = vld [vmem:[#allocation5 + $0x1f8] sm:$0xff] }
  0x1f   :  { %288 = vmatpush.msra.mxu0 %v179_v35  ;;  %368 = vmatpush.msra.mxu3 %v180_v37  ;;  %v237_v49 = vld [vmem:[#allocation5 + $0x230] sm:$0xff]  ;;  %v171_v52 = vld [vmem:[#allocation5 + $0x20] sm:$0xff]  ;;  %v909_v0 = vld.sshfl [vmem:[#allocation1 + $0x10] sm:$0xff pattern:$0x73625140] }
  0x20   :  { %328 = vmatpush.msra.mxu2 %v243_v36  ;;  %307 = vmatpush.msra.mxu1 %v213_v38  ;;  %v235_v53 = vld [vmem:[#allocation5 + $0x220] sm:$0xff]  ;;  %v169_v55 = vld [vmem:[#allocation5 + $0x10] sm:$0xff]  ;;  %v911_v1 = vld.sshfl [vmem:[#allocation1] sm:$0xff pattern:$0x73625140] }
  0x21   :  { %289 = vmatpush.msra.mxu0 %v177_v39  ;;  %369 = vmatpush.msra.mxu3 %v178_v41  ;;  %v205_v56 = vld [vmem:[#allocation5 + $0x130] sm:$0xff]  ;;  %v167_v59 = vld [vmem:[#allocation5] sm:$0xff]  ;;  %v228_v8 = vld [vmem:[#allocation5 + $0x1e8] sm:$0xff] }
  0x22   :  { %329 = vmatpush.msra.mxu2 %v241_v40  ;;  %308 = vmatpush.msra.mxu1 %v211_v42  ;;  %v233_v57 = vld [vmem:[#allocation5 + $0x210] sm:$0xff]  ;;  %v203_v60 = vld [vmem:[#allocation5 + $0x120] sm:$0xff]  ;;  %v226_v12 = vld [vmem:[#allocation5 + $0x1d8] sm:$0xff] }
  0x23   :  { %290 = vmatpush.msra.mxu0 %v175_v43  ;;  %370 = vmatpush.msra.mxu3 %v176_v46  ;;  %v231_v61 = vld [vmem:[#allocation5 + $0x200] sm:$0xff]  ;;  %v915_v3 = vld.sshfl [vmem:[#allocation1 + $0x18] sm:$0xff pattern:$0x73625140]  ;;  %v262_v14 = vld [vmem:[#allocation5 + $0x2f8] sm:$0xff] }
  0x24   :  { %330 = vmatpush.msra.mxu2 %v239_v44  ;;  %309 = vmatpush.msra.mxu1 %v209_v47  ;;  %v913_v2 = vld.sshfl [vmem:[#allocation1 + $0x8] sm:$0xff pattern:$0x73625140]  ;;  %v96_v5 = vld [vmem:[#allocation2 + $0xf0] sm:$0xff]  ;;  %v266_v15 = vld [vmem:[#allocation5 + $0x318] sm:$0xff] }
  0x25   :  { %291 = vmatpush.msra.mxu0 %v173_v48  ;;  %371 = vmatpush.msra.mxu3 %v174_v50  ;;  %440 = vst [vmem:[#allocation1] ss:$4 sm:$0xff] %v65_v63  ;;  %v201_v6 = vld [vmem:[#allocation5 + $0x110] sm:$0xff]  ;;  %v94_v9 = vld [vmem:[#allocation2 + $0xe0] sm:$0xff]  ;;  %v224_v16 = vld [vmem:[#allocation5 + $0x1c8] sm:$0xff] }
  0x26   :  { %331 = vmatpush.msra.mxu2 %v237_v49  ;;  %310 = vmatpush.msra.mxu1 %v207_v51  ;;  %v265_v7 = vld [vmem:[#allocation5 + $0x310] sm:$0xff]  ;;  %v199_v10 = vld [vmem:[#allocation5 + $0x100] sm:$0xff]  ;;  %v260_v18 = vld [vmem:[#allocation5 + $0x2e8] sm:$0xff] }
  0x27   :  { %292 = vmatpush.msra.mxu0 %v171_v52  ;;  %372 = vmatpush.msra.mxu3 %v172_v54  ;;  %v263_v11 = vld [vmem:[#allocation5 + $0x300] sm:$0xff]  ;;  %v92_v13 = vld [vmem:[#allocation2 + $0xd0] sm:$0xff]  ;;  %v264_v19 = vld [vmem:[#allocation5 + $0x308] sm:$0xff] }
  0x28   :  { %332 = vmatpush.msra.mxu2 %v235_v53  ;;  %311 = vmatpush.msra.mxu1 %v205_v56  ;;  %v90_v17 = vld [vmem:[#allocation2 + $0xc0] sm:$0xff]  ;;  %v222_v20 = vld [vmem:[#allocation5 + $0x1b8] sm:$0xff]  ;;  %v88_v21 = vld [vmem:[#allocation2 + $0xb0] sm:$0xff] }
  0x29   :  { %293 = vmatpush.msra.mxu0 %v169_v55  ;;  %373 = vmatpush.msra.mxu3 %v170_v58  ;;  %v128_v22 = vld [vmem:[#allocation2 + $0x1f0] sm:$0xff]  ;;  %v258_v23 = vld [vmem:[#allocation5 + $0x2d8] sm:$0xff]  ;;  %v220_v24 = vld [vmem:[#allocation5 + $0x1a8] sm:$0xff] }
  0x2a   :  { %333 = vmatpush.msra.mxu2 %v233_v57  ;;  %312 = vmatpush.msra.mxu1 %v203_v60  ;;  %v86_v25 = vld [vmem:[#allocation2 + $0xa0] sm:$0xff]  ;;  %v256_v27 = vld [vmem:[#allocation5 + $0x2c8] sm:$0xff]  ;;  %v218_v28 = vld [vmem:[#allocation5 + $0x198] sm:$0xff] }
  0x2b   :  { %294 = vmatpush.msra.mxu0 %v167_v59  ;;  %374 = vmatpush.msra.mxu3 %v168_v62  ;;  %v126_v26 = vld [vmem:[#allocation2 + $0x1e0] sm:$0xff]  ;;  %v84_v29 = vld [vmem:[#allocation2 + $0x90] sm:$0xff]  ;;  %v254_v31 = vld [vmem:[#allocation5 + $0x2b8] sm:$0xff] }
  0x2c   :  { %334 = vmatpush.msra.mxu2 %v231_v61  ;;  %313 = vmatpush.msra.mxu1 %v201_v6  ;;  %v124_v30 = vld [vmem:[#allocation2 + $0x1d0] sm:$0xff]  ;;  %v216_v32 = vld [vmem:[#allocation5 + $0x188] sm:$0xff]  ;;  %v82_v33 = vld [vmem:[#allocation2 + $0x80] sm:$0xff] }
  0x2d   :  { %335 = vmatmul.f32.vlgmr.msra.gmra.mxu2 %v909_v0  ;;  %379 = vmatpush.msrb.mxu0 %v230_v4  ;;  %v122_v34 = vld [vmem:[#allocation2 + $0x1c0] sm:$0xff]  ;;  %v252_v35 = vld [vmem:[#allocation5 + $0x2a8] sm:$0xff]  ;;  %v214_v36 = vld [vmem:[#allocation5 + $0x178] sm:$0xff] }
  0x2e   :  { %450 = vmatpush.msrb.mxu3 %v96_v5  ;;  %353 = vmatpush.msrb.mxu2 %v265_v7  ;;  %v80_v37 = vld [vmem:[#allocation2 + $0x70] sm:$0xff]  ;;  %v250_v39 = vld [vmem:[#allocation5 + $0x298] sm:$0xff]  ;;  %v212_v40 = vld [vmem:[#allocation5 + $0x168] sm:$0xff] }
  0x2f   :  { %380 = vmatpush.msrb.mxu0 %v228_v8  ;;  %314 = vmatpush.msra.mxu1 %v199_v10  ;;  %v120_v38 = vld [vmem:[#allocation2 + $0x1b0] sm:$0xff]  ;;  %v78_v41 = vld [vmem:[#allocation2 + $0x60] sm:$0xff]  ;;  %v248_v43 = vld [vmem:[#allocation5 + $0x288] sm:$0xff] }
  0x30   :  { %451 = vmatpush.msrb.mxu3 %v94_v9  ;;  %295 = vmatmul.f32.vlgmr.msra.gmra.mxu0 %v911_v1  ;;  %v118_v42 = vld [vmem:[#allocation2 + $0x1a0] sm:$0xff]  ;;  %v210_v44 = vld [vmem:[#allocation5 + $0x158] sm:$0xff]  ;;  %v76_v45 = vld [vmem:[#allocation2 + $0x50] sm:$0xff] }
  0x31   :  { %315 = vmatmul.f32.vlgmr.msra.gmra.mxu1 %v913_v2  ;;  %354 = vmatpush.msrb.mxu2 %v263_v11  ;;  %v116_v46 = vld [vmem:[#allocation2 + $0x190] sm:$0xff]  ;;  %v246_v47 = vld [vmem:[#allocation5 + $0x278] sm:$0xff]  ;;  %v208_v48 = vld [vmem:[#allocation5 + $0x148] sm:$0xff] }
  0x32   :  { %381 = vmatpush.msrb.mxu0 %v226_v12  ;;  %452 = vmatpush.msrb.mxu3 %v92_v13  ;;  %v74_v49 = vld [vmem:[#allocation2 + $0x40] sm:$0xff]  ;;  %v244_v51 = vld [vmem:[#allocation5 + $0x268] sm:$0xff]  ;;  %v206_v52 = vld [vmem:[#allocation5 + $0x138] sm:$0xff] }
  0x33   :  { %399 = vmatpush.msrb.mxu1 %v262_v14  ;;  %433 = vmatpush.msra.mxu2 %v266_v15  ;;  %v114_v50 = vld [vmem:[#allocation2 + $0x180] sm:$0xff]  ;;  %v72_v53 = vld [vmem:[#allocation2 + $0x30] sm:$0xff]  ;;  %v242_v55 = vld [vmem:[#allocation5 + $0x258] sm:$0xff] }
  0x34   :  { %382 = vmatpush.msrb.mxu0 %v224_v16  ;;  %453 = vmatpush.msrb.mxu3 %v90_v17  ;;  %v112_v54 = vld [vmem:[#allocation2 + $0x170] sm:$0xff]  ;;  %v204_v56 = vld [vmem:[#allocation5 + $0x128] sm:$0xff]  ;;  %v70_v57 = vld [vmem:[#allocation2 + $0x20] sm:$0xff] }
  0x35   :  { %400 = vmatpush.msrb.mxu1 %v260_v18  ;;  %434 = vmatpush.msra.mxu2 %v264_v19  ;;  %v110_v58 = vld [vmem:[#allocation2 + $0x160] sm:$0xff]  ;;  %v240_v59 = vld [vmem:[#allocation5 + $0x248] sm:$0xff]  ;;  %v202_v60 = vld [vmem:[#allocation5 + $0x118] sm:$0xff] }
  0x36   :  { %752 = vmatmul.msk.f32.vlgmr.msrb.gmra.mxu2 %vm276_vm0, %v915_v3  ;;  %383 = vmatpush.msrb.mxu0 %v222_v20  ;;  %v68_v61 = vld [vmem:[#allocation2 + $0x10] sm:$0xff]  ;;  %v238_v63 = vld [vmem:[#allocation5 + $0x238] sm:$0xff]  ;;  %v200_v4 = vld [vmem:[#allocation5 + $0x108] sm:$0xff] }
  0x37   :  { %454 = vmatpush.msrb.mxu3 %v88_v21  ;;  %470 = vmatpush.msrb.mxu2 %v128_v22  ;;  %v108_v62 = vld [vmem:[#allocation2 + $0x150] sm:$0xff]  ;;  %v66_v5 = vld [vmem:[#allocation2] sm:$0xff]  ;;  %v236_v6 = vld [vmem:[#allocation5 + $0x228] sm:$0xff] }
  0x38   :  { %401 = vmatpush.msrb.mxu1 %v258_v23  ;;  %384 = vmatpush.msrb.mxu0 %v220_v24  ;;  %v923_v7 = vld.sshfl [vmem:[#allocation1] sm:$0xff pattern:$0x73625140]  ;;  %v160_v8 = vld [vmem:[#allocation2 + $0x2f0] sm:$0xff]  ;;  %v158_v12 = vld [vmem:[#allocation2 + $0x2e0] sm:$0xff] }
  0x39   :  { %455 = vmatpush.msrb.mxu3 %v86_v25  ;;  %471 = vmatpush.msrb.mxu2 %v126_v26  ;;  %v97_v9 = vld [vmem:[#allocation2 + $0xf8] sm:$0xff]  ;;  %v104_v10 = vld [vmem:[#allocation2 + $0x130] sm:$0xff]  ;;  %v95_v13 = vld [vmem:[#allocation2 + $0xe8] sm:$0xff] }
  0x3a   :  { %402 = vmatpush.msrb.mxu1 %v256_v27  ;;  %385 = vmatpush.msrb.mxu0 %v218_v28  ;;  %v234_v11 = vld [vmem:[#allocation5 + $0x218] sm:$0xff]  ;;  %v102_v14 = vld [vmem:[#allocation2 + $0x120] sm:$0xff]  ;;  %v232_v15 = vld [vmem:[#allocation5 + $0x208] sm:$0xff] }
  0x3b   :  { %456 = vmatpush.msrb.mxu3 %v84_v29  ;;  %472 = vmatpush.msrb.mxu2 %v124_v30  ;;  %v156_v16 = vld [vmem:[#allocation2 + $0x2d0] sm:$0xff]  ;;  %v93_v17 = vld [vmem:[#allocation2 + $0xd8] sm:$0xff]  ;;  %v154_v20 = vld [vmem:[#allocation2 + $0x2c0] sm:$0xff] }
  0x3c   :  { %403 = vmatpush.msrb.mxu1 %v254_v31  ;;  %386 = vmatpush.msrb.mxu0 %v216_v32  ;;  %v100_v18 = vld [vmem:[#allocation2 + $0x110] sm:$0xff]  ;;  %v98_v21 = vld [vmem:[#allocation2 + $0x100] sm:$0xff]  ;;  %v89_v25 = vld [vmem:[#allocation2 + $0xb8] sm:$0xff] }
  0x3d   :  { %457 = vmatpush.msrb.mxu3 %v82_v33  ;;  %473 = vmatpush.msrb.mxu2 %v122_v34  ;;  %v164_v19 = vld [vmem:[#allocation2 + $0x310] sm:$0xff]  ;;  %v162_v22 = vld [vmem:[#allocation2 + $0x300] sm:$0xff]  ;;  %v129_v26 = vld [vmem:[#allocation2 + $0x1f8] sm:$0xff] }
  0x3e   :  { %404 = vmatpush.msrb.mxu1 %v252_v35  ;;  %387 = vmatpush.msrb.mxu0 %v214_v36  ;;  %v928_v23 = vld.sshfl [vmem:[#allocation1 + $0x8] sm:$0xff pattern:$0x73625140]  ;;  %v152_v24 = vld [vmem:[#allocation2 + $0x2b0] sm:$0xff]  ;;  %v161_v27 = vld [vmem:[#allocation2 + $0x2f8] sm:$0xff] }
  0x3f   :  { %458 = vmatpush.msrb.mxu3 %v80_v37  ;;  %474 = vmatpush.msrb.mxu2 %v120_v38  ;;  %v87_v28 = vld [vmem:[#allocation2 + $0xa8] sm:$0xff]  ;;  %v150_v29 = vld [vmem:[#allocation2 + $0x2a0] sm:$0xff]  ;;  %v85_v32 = vld [vmem:[#allocation2 + $0x98] sm:$0xff] }
  0x40   :  { %405 = vmatpush.msrb.mxu1 %v250_v39  ;;  %388 = vmatpush.msrb.mxu0 %v212_v40  ;;  %v127_v30 = vld [vmem:[#allocation2 + $0x1e8] sm:$0xff]  ;;  %v148_v33 = vld [vmem:[#allocation2 + $0x290] sm:$0xff]  ;;  %v125_v34 = vld [vmem:[#allocation2 + $0x1d8] sm:$0xff] }
  0x41   :  { %459 = vmatpush.msrb.mxu3 %v78_v41  ;;  %475 = vmatpush.msrb.mxu2 %v118_v42  ;;  %v159_v31 = vld [vmem:[#allocation2 + $0x2e8] sm:$0xff]  ;;  %v157_v35 = vld [vmem:[#allocation2 + $0x2d8] sm:$0xff]  ;;  %v146_v36 = vld [vmem:[#allocation2 + $0x280] sm:$0xff] }
  0x42   :  { %406 = vmatpush.msrb.mxu1 %v248_v43  ;;  %389 = vmatpush.msrb.mxu0 %v210_v44  ;;  %v123_v37 = vld [vmem:[#allocation2 + $0x1c8] sm:$0xff]  ;;  %v81_v39 = vld [vmem:[#allocation2 + $0x78] sm:$0xff]  ;;  %v144_v40 = vld [vmem:[#allocation2 + $0x270] sm:$0xff] }
  0x43   :  { %460 = vmatpush.msrb.mxu3 %v76_v45  ;;  %476 = vmatpush.msrb.mxu2 %v116_v46  ;;  %v155_v38 = vld [vmem:[#allocation2 + $0x2c8] sm:$0xff]  ;;  %v121_v41 = vld [vmem:[#allocation2 + $0x1b8] sm:$0xff]  ;;  %v142_v43 = vld [vmem:[#allocation2 + $0x260] sm:$0xff] }
  0x44   :  { %407 = vmatpush.msrb.mxu1 %v246_v47  ;;  %390 = vmatpush.msrb.mxu0 %v208_v48  ;;  %v79_v42 = vld [vmem:[#allocation2 + $0x68] sm:$0xff]  ;;  %v77_v46 = vld [vmem:[#allocation2 + $0x58] sm:$0xff]  ;;  %v140_v47 = vld [vmem:[#allocation2 + $0x250] sm:$0xff] }
  0x45   :  { %461 = vmatpush.msrb.mxu3 %v74_v49  ;;  %477 = vmatpush.msrb.mxu2 %v114_v50  ;;  %v119_v44 = vld [vmem:[#allocation2 + $0x1a8] sm:$0xff]  ;;  %v117_v48 = vld [vmem:[#allocation2 + $0x198] sm:$0xff] }
  0x46   :  { %375 = vmatmul.f32.vlgmr.msra.gmra.mxu3 %v911_v1  ;;  %408 = vmatpush.msrb.mxu1 %v244_v51  ;;  %v106_v1 = vld [vmem:[#allocation2 + $0x140] sm:$0xff]  ;;  %v151_v45 = vld [vmem:[#allocation2 + $0x2a8] sm:$0xff]  ;;  %v149_v49 = vld [vmem:[#allocation2 + $0x298] sm:$0xff] }
  0x47   :  { %391 = vmatpush.msrb.mxu0 %v206_v52  ;;  %462 = vmatpush.msrb.mxu3 %v72_v53  ;;  %v75_v50 = vld [vmem:[#allocation2 + $0x48] sm:$0xff]  ;;  %v138_v51 = vld [vmem:[#allocation2 + $0x240] sm:$0xff] }
  0x48   :  { %478 = vmatpush.msrb.mxu2 %v112_v54  ;;  %409 = vmatpush.msrb.mxu1 %v242_v55  ;;  %v115_v52 = vld [vmem:[#allocation2 + $0x188] sm:$0xff]  ;;  %v73_v54 = vld [vmem:[#allocation2 + $0x38] sm:$0xff]  ;;  %v136_v55 = vld [vmem:[#allocation2 + $0x230] sm:$0xff] }
  0x49   :  { %392 = vmatpush.msrb.mxu0 %v204_v56  ;;  %463 = vmatpush.msrb.mxu3 %v70_v57  ;;  %v147_v53 = vld [vmem:[#allocation2 + $0x288] sm:$0xff]  ;;  %v113_v56 = vld [vmem:[#allocation2 + $0x178] sm:$0xff] }
  0x4a   :  { %479 = vmatpush.msrb.mxu2 %v110_v58  ;;  %410 = vmatpush.msrb.mxu1 %v240_v59  ;;  %v145_v57 = vld [vmem:[#allocation2 + $0x278] sm:$0xff]  ;;  %v71_v58 = vld [vmem:[#allocation2 + $0x28] sm:$0xff]  ;;  %v134_v59 = vld [vmem:[#allocation2 + $0x220] sm:$0xff] }
  0x4b   :  { %393 = vmatpush.msrb.mxu0 %v202_v60  ;;  %464 = vmatpush.msrb.mxu3 %v68_v61  ;;  %v111_v60 = vld [vmem:[#allocation2 + $0x168] sm:$0xff] }
  0x4c   :  { %480 = vmatpush.msrb.mxu2 %v108_v62  ;;  %411 = vmatpush.msrb.mxu1 %v238_v63  ;;  %v143_v61 = vld [vmem:[#allocation2 + $0x268] sm:$0xff]  ;;  %v69_v62 = vld [vmem:[#allocation2 + $0x18] sm:$0xff]  ;;  %v132_v63 = vld [vmem:[#allocation2 + $0x210] sm:$0xff] }
  0x4d   :  { %394 = vmatpush.msrb.mxu0 %v200_v4  ;;  %465 = vmatpush.msrb.mxu3 %v66_v5  ;;  %v109_v4 = vld [vmem:[#allocation2 + $0x158] sm:$0xff] }
  0x4e   :  { %481 = vmatpush.msrb.mxu2 %v106_v1  ;;  %412 = vmatpush.msrb.mxu1 %v236_v6  ;;  %v141_v5 = vld [vmem:[#allocation2 + $0x258] sm:$0xff]  ;;  %v67_v1 = vld [vmem:[#allocation2 + $0x8] sm:$0xff]  ;;  %v130_v6 = vld [vmem:[#allocation2 + $0x200] sm:$0xff] }
  0x4f   :  { %753 = vmatmul.msk.f32.vlgmr.msra.gmra.mxu2 %vm276_vm0, %v915_v3  ;;  %466 = vmatmul.f32.vlgmr.msrb.gmra.mxu3 %v923_v7  ;;  %v91_v3 = vld [vmem:[#allocation2 + $0xc8] sm:$0xff] }
  0x50   :  { %490 = vmatpush.msra.mxu0 %v160_v8  ;;  %530 = vmatpush.msra.mxu3 %v97_v9  ;;  %v107_v8 = vld [vmem:[#allocation2 + $0x148] sm:$0xff] }
  0x51   :  { %482 = vmatpush.msrb.mxu2 %v104_v10  ;;  %413 = vmatpush.msrb.mxu1 %v234_v11  ;;  %v139_v9 = vld [vmem:[#allocation2 + $0x248] sm:$0xff]  ;;  %v444_v11 = vld.sshfl [vmem:[#allocation1 + $0x18] sm:$0xff pattern:$0x73625140] }
  0x52   :  { %491 = vmatpush.msra.mxu0 %v158_v12  ;;  %531 = vmatpush.msra.mxu3 %v95_v13  ;;  %v443_v10 = vld.sshfl [vmem:[#allocation1 + $0x10] sm:$0xff pattern:$0x73625140]  ;;  %v105_v12 = vld [vmem:[#allocation2 + $0x138] sm:$0xff] }
  0x53   :  { %483 = vmatpush.msrb.mxu2 %v102_v14  ;;  %414 = vmatpush.msrb.mxu1 %v232_v15  ;;  %v137_v13 = vld [vmem:[#allocation2 + $0x238] sm:$0xff]  ;;  %v103_v14 = vld [vmem:[#allocation2 + $0x128] sm:$0xff] }
  0x54   :  { %492 = vmatpush.msra.mxu0 %v156_v16  ;;  %532 = vmatpush.msra.mxu3 %v93_v17  ;;  %v135_v15 = vld [vmem:[#allocation2 + $0x228] sm:$0xff]  ;;  %v101_v16 = vld [vmem:[#allocation2 + $0x118] sm:$0xff] }
  0x55   :  { %484 = vmatpush.msrb.mxu2 %v100_v18  ;;  %524 = vmatpush.msra.mxu1 %v164_v19  ;;  %v133_v17 = vld [vmem:[#allocation2 + $0x218] sm:$0xff]  ;;  %v99_v18 = vld [vmem:[#allocation2 + $0x108] sm:$0xff] }
  0x56   :  { %493 = vmatpush.msra.mxu0 %v154_v20  ;;  %533 = vmatpush.msra.mxu3 %v91_v3  ;;  %v131_v19 = vld [vmem:[#allocation2 + $0x208] sm:$0xff]  ;;  %v165_v20 = vld [vmem:[#allocation2 + $0x318] sm:$0xff] }
  0x57   :  { %485 = vmatpush.msrb.mxu2 %v98_v21  ;;  %525 = vmatpush.msra.mxu1 %v162_v22  ;;  %v163_v3 = vld [vmem:[#allocation2 + $0x308] sm:$0xff]  ;;  %v633_v22 = vld [vmem:[%s1074_s5 + $0x68] sm:$0xff] }
  0x58   :  { %415 = vmatmul.f32.vlgmr.msrb.gmra.mxu1 %v909_v0  ;;  %486 = vmatmul.f32.vlgmr.msrb.gmra.mxu2 %v928_v23  ;;  %v83_v0 = vld [vmem:[#allocation2 + $0x88] sm:$0xff] }
  0x59   :  { %494 = vmatpush.msra.mxu0 %v152_v24  ;;  %534 = vmatpush.msra.mxu3 %v89_v25  ;;  %v634_v21 = vld [vmem:[%s1074_s5 + $0x70] sm:$0xff]  ;;  %v631_v24 = vld [vmem:[%s1074_s5 + $0x58] sm:$0xff] }
  0x5a   :  { %550 = vmatpush.msrb.mxu1 %v129_v26  ;;  %570 = vmatpush.msra.mxu2 %v161_v27  ;;  %v651_v25 = vld [vmem:[%s1074_s5 + $0xf8] sm:$0xff]  ;;  %v630_v26 = vld [vmem:[%s1074_s5 + $0x50] sm:$0xff]  ;;  %v629_v27 = vld [vmem:[%s1074_s5 + $0x48] sm:$0xff] }
  0x5b   :  { %395 = vmatmul.f32.vlgmr.msrb.gmra.mxu0 %v913_v2  ;;  %535 = vmatpush.msra.mxu3 %v87_v28  ;;  %v153_v2 = vld [vmem:[#allocation2 + $0x2b8] sm:$0xff] }
  0x5c   :  { %495 = vmatpush.msra.mxu0 %v150_v29  ;;  %551 = vmatpush.msrb.mxu1 %v127_v30  ;;  %v628_v28 = vld [vmem:[%s1074_s5 + $0x40] sm:$0xff]  ;;  %v627_v29 = vld [vmem:[%s1074_s5 + $0x38] sm:$0xff]  ;;  %v626_v30 = vld [vmem:[%s1074_s5 + $0x30] sm:$0xff] }
  0x5d   :  { %571 = vmatpush.msra.mxu2 %v159_v31  ;;  %536 = vmatpush.msra.mxu3 %v85_v32  ;;  %v625_v31 = vld [vmem:[%s1074_s5 + $0x28] sm:$0xff] }
  0x5e   :  { %496 = vmatpush.msra.mxu0 %v148_v33  ;;  %552 = vmatpush.msrb.mxu1 %v125_v34  ;;  %v624_v33 = vld [vmem:[%s1074_s5 + $0x20] sm:$0xff]  ;;  %v650_v34 = vld [vmem:[%s1074_s5 + $0xf0] sm:$0xff] }
  0x5f   :  { %572 = vmatpush.msra.mxu2 %v157_v35  ;;  %537 = vmatpush.msra.mxu3 %v83_v0  ;;  %v623_v35 = vld [vmem:[%s1074_s5 + $0x18] sm:$0xff]  ;;  %v649_v0 = vld [vmem:[%s1074_s5 + $0xe8] sm:$0xff] }
  0x60   :  { %497 = vmatpush.msra.mxu0 %v146_v36  ;;  %553 = vmatpush.msrb.mxu1 %v123_v37  ;;  %v622_v36 = vld [vmem:[%s1074_s5 + $0x10] sm:$0xff]  ;;  %v648_v37 = vld [vmem:[%s1074_s5 + $0xe0] sm:$0xff] }
  0x61   :  { %573 = vmatpush.msra.mxu2 %v155_v38  ;;  %538 = vmatpush.msra.mxu3 %v81_v39  ;;  %v621_v38 = vld [vmem:[%s1074_s5 + $0x8] sm:$0xff]  ;;  %v647_v39 = vld [vmem:[%s1074_s5 + $0xd8] sm:$0xff] }
  0x62   :  { %498 = vmatpush.msra.mxu0 %v144_v40  ;;  %554 = vmatpush.msrb.mxu1 %v121_v41  ;;  %v620_v40 = vld [vmem:[%s1074_s5] sm:$0xff]  ;;  %v646_v41 = vld [vmem:[%s1074_s5 + $0xd0] sm:$0xff] }
  0x63   :  { %574 = vmatpush.msra.mxu2 %v153_v2  ;;  %539 = vmatpush.msra.mxu3 %v79_v42  ;;  %v645_v42 = vld [vmem:[%s1074_s5 + $0xc8] sm:$0xff] }
  0x64   :  { %499 = vmatpush.msra.mxu0 %v142_v43  ;;  %555 = vmatpush.msrb.mxu1 %v119_v44  ;;  %v644_v43 = vld [vmem:[%s1074_s5 + $0xc0] sm:$0xff]  ;;  %v643_v44 = vld [vmem:[%s1074_s5 + $0xb8] sm:$0xff] }
  0x65   :  { %575 = vmatpush.msra.mxu2 %v151_v45  ;;  %540 = vmatpush.msra.mxu3 %v77_v46 }
  0x66   :  { %500 = vmatpush.msra.mxu0 %v140_v47  ;;  %556 = vmatpush.msrb.mxu1 %v117_v48  ;;  %v642_v47 = vld [vmem:[%s1074_s5 + $0xb0] sm:$0xff]  ;;  %v641_v48 = vld [vmem:[%s1074_s5 + $0xa8] sm:$0xff] }
  0x67   :  { %576 = vmatpush.msra.mxu2 %v149_v49  ;;  %541 = vmatpush.msra.mxu3 %v75_v50 }
  0x68   :  { %501 = vmatpush.msra.mxu0 %v138_v51  ;;  %557 = vmatpush.msrb.mxu1 %v115_v52  ;;  %v640_v51 = vld [vmem:[%s1074_s5 + $0xa0] sm:$0xff] }
  0x69   :  { %577 = vmatpush.msra.mxu2 %v147_v53  ;;  %542 = vmatpush.msra.mxu3 %v73_v54  ;;  %v639_v53 = vld [vmem:[%s1074_s5 + $0x98] sm:$0xff] }
  0x6a   :  { %502 = vmatpush.msra.mxu0 %v136_v55  ;;  %558 = vmatpush.msrb.mxu1 %v113_v56  ;;  %v638_v55 = vld [vmem:[%s1074_s5 + $0x90] sm:$0xff] }
  0x6b   :  { %578 = vmatpush.msra.mxu2 %v145_v57  ;;  %543 = vmatpush.msra.mxu3 %v71_v58 }
  0x6c   :  { %503 = vmatpush.msra.mxu0 %v134_v59  ;;  %559 = vmatpush.msrb.mxu1 %v111_v60  ;;  %v637_v59 = vld [vmem:[%s1074_s5 + $0x88] sm:$0xff] }
  0x6d   :  { %579 = vmatpush.msra.mxu2 %v143_v61  ;;  %544 = vmatpush.msra.mxu3 %v69_v62  ;;  %v636_v62 = vld [vmem:[%s1074_s5 + $0x80] sm:$0xff] }
  0x6e   :  { %504 = vmatpush.msra.mxu0 %v132_v63  ;;  %560 = vmatpush.msrb.mxu1 %v109_v4  ;;  %v610_v4 = vld [vmem:[%s1073_s4] sm:$0x3] }
  0x6f   :  { %580 = vmatpush.msra.mxu2 %v141_v5  ;;  %545 = vmatpush.msra.mxu3 %v67_v1 }
  0x70   :  { %505 = vmatpush.msra.mxu0 %v130_v6  ;;  %561 = vmatpush.msrb.mxu1 %v107_v8  ;;  %v612_v8 = vperm.slane %v610_v4, 0 }
  0x71   :  { %581 = vmatpush.msra.mxu2 %v139_v9  ;;  %506 = vmatmul.f32.vlgmr.msra.gmra.mxu0 %v443_v10 }
  0x72   :  { %754 = vmatmul.msk.f32.vlgmr.msra.gmra.mxu1 %vm276_vm0, %v444_v11  ;;  %546 = vmatmul.f32.vlgmr.msra.gmra.mxu3 %v923_v7  ;;  %v635_v7 = vld [vmem:[%s1074_s5 + $0x78] sm:$0xff] }
  0x73   :  { %562 = vmatpush.msrb.mxu1 %v105_v12  ;;  %582 = vmatpush.msra.mxu2 %v137_v13 }
  0x74   :  { %656 = vmatpush.msrb.mxu3 %v635_v7  ;;  %676 = vmatpush.msrb.mxu0 %v651_v25  ;;  %v613_v7 = vperm.slane %v610_v4, 1  ;;  %v704_v25 = vld [vmem:[%s1076_s7 + $0x38] sm:$0xff] }
  0x75   :  { %563 = vmatpush.msrb.mxu1 %v103_v14  ;;  %583 = vmatpush.msra.mxu2 %v135_v15 }
  0x76   :  { %657 = vmatpush.msrb.mxu3 %v634_v21  ;;  %677 = vmatpush.msrb.mxu0 %v650_v34 }
  0x77   :  { %564 = vmatpush.msrb.mxu1 %v101_v16  ;;  %584 = vmatpush.msra.mxu2 %v133_v17 }
  0x78   :  { %658 = vmatpush.msrb.mxu3 %v633_v22  ;;  %678 = vmatpush.msrb.mxu0 %v649_v0 }
  0x79   :  { %565 = vmatpush.msrb.mxu1 %v99_v18  ;;  %585 = vmatpush.msra.mxu2 %v131_v19 }
  0x7a   :  { %566 = vmatmul.f32.vlgmr.msrb.gmra.mxu1 %v928_v23  ;;  %586 = vmatmul.f32.vlgmr.msra.gmra.mxu2 %v443_v10  ;;  %v632_v23 = vld [vmem:[%s1074_s5 + $0x60] sm:$0xff] }
  0x7b   :  { %604 = vmatpush.msrb.mxu2 %v165_v20  ;;  %659 = vmatpush.msrb.mxu3 %v632_v23 }
  0x7c   :  { %679 = vmatpush.msrb.mxu0 %v648_v37  ;;  %721 = vmatpush.msra.mxu1 %v704_v25 }
  0x7d   :  { %605 = vmatpush.msrb.mxu2 %v163_v3  ;;  %660 = vmatpush.msrb.mxu3 %v631_v24 }
  0x7e   :  { %680 = vmatpush.msrb.mxu0 %v647_v39 }
  0x7f   :  { %661 = vmatpush.msrb.mxu3 %v630_v26  ;;  %v703_v26 = vld [vmem:[%s1076_s7 + $0x30] sm:$0xff] }
  0x80   :  { %681 = vmatpush.msrb.mxu0 %v646_v41  ;;  %722 = vmatpush.msra.mxu1 %v703_v26 }
  0x81   :  { %662 = vmatpush.msrb.mxu3 %v629_v27  ;;  %v702_v27 = vld [vmem:[%s1076_s7 + $0x28] sm:$0xff] }
  0x82   :  { %755 = vmatmul.msk.f32.vlgmr.msrb.gmra.mxu2 %vm276_vm0, %v444_v11  ;;  %682 = vmatpush.msrb.mxu0 %v645_v42 }
  0x83   :  { %663 = vmatpush.msrb.mxu3 %v628_v28  ;;  %v701_v28 = vld [vmem:[%s1076_s7 + $0x20] sm:$0xff]  ;;  %723 = vmatpush.msra.mxu1 %v702_v27 }
  0x84   :  { %683 = vmatpush.msrb.mxu0 %v644_v43 }
  0x85   :  { %664 = vmatpush.msrb.mxu3 %v627_v29  ;;  %v700_v29 = vld [vmem:[%s1076_s7 + $0x18] sm:$0xff]  ;;  %724 = vmatpush.msra.mxu1 %v701_v28 }
  0x86   :  { %684 = vmatpush.msrb.mxu0 %v643_v44 }
  0x87   :  { %665 = vmatpush.msrb.mxu3 %v626_v30  ;;  %725 = vmatpush.msra.mxu1 %v700_v29  ;;  %v699_v30 = vld [vmem:[%s1076_s7 + $0x10] sm:$0xff] }
  0x88   :  { %685 = vmatpush.msrb.mxu0 %v642_v47 }
  0x89   :  { %666 = vmatpush.msrb.mxu3 %v625_v31  ;;  %726 = vmatpush.msra.mxu1 %v699_v30  ;;  %v698_v31 = vld [vmem:[%s1076_s7 + $0x8] sm:$0xff] }
  0x8a   :  { %686 = vmatpush.msrb.mxu0 %v641_v48 }
  0x8b   :  { %667 = vmatpush.msrb.mxu3 %v624_v33  ;;  %727 = vmatpush.msra.mxu1 %v698_v31  ;;  %v762_v33 = vld [vmem:[%s1075_s6] ss:$0 sm:$0xff] }
  0x8c   :  { %687 = vmatpush.msrb.mxu0 %v640_v51 }
  0x8d   :  { %668 = vmatpush.msrb.mxu3 %v623_v35 }
  0x8e   :  { %688 = vmatpush.msrb.mxu0 %v639_v53 }
  0x8f   :  { %669 = vmatpush.msrb.mxu3 %v622_v36 }
  0x90   :  { %689 = vmatpush.msrb.mxu0 %v638_v55 }
  0x91   :  { %670 = vmatpush.msrb.mxu3 %v621_v38  ;;  %v763_v38 = vld [vmem:[%s1077_s8] ss:$0 sm:$0xff] }
  0x92   :  { %690 = vmatpush.msrb.mxu0 %v637_v59 }
  0x93   :  { %671 = vmatpush.msrb.mxu3 %v620_v40 }
  0x94   :  { %691 = vmatpush.msrb.mxu0 %v636_v62 }
  0xad   :  { %v296_v45 = vpop.f32.mrf.mxu0 }
  0xae   :  { %v316_v49 = vpop.f32.mrf.mxu1 }
  0xaf   :  { %v317_v52 = vadd.f32 %v316_v49, %v296_v45 }
  0xb0   :  { %v336_v32 = vpop.f32.mrf.mxu2 }
  0xb1   :  { %v337_v56 = vadd.f32 %v336_v32, %v317_v52  ;;  %v697_v32 = vld [vmem:[%s1076_s7] sm:$0xff] }
  0xb2   :  { %728 = vmatpush.msra.mxu1 %v697_v32 }
  0xb9   :  { %v356_v2 = vpop.f32.mrf.mxu2 }
  0xba   :  { %v357_v60 = vadd.f32 %v356_v2, %v337_v56 }
  0xc9   :  { %v376_v46 = vpop.f32.mrf.mxu3 }
  0xd2   :  { %v436_v50 = vpop.f32.mrf.mxu2  ;;  %v467_v57 = vpop.f32.mrf.mxu3 }
  0xd3   :  { %v468_v63 = vadd.f32 %v467_v57, %v357_v60 }
  0xd5   :  { %v416_v58 = vpop.f32.mrf.mxu1 }
  0xd8   :  { %v396_v54 = vpop.f32.mrf.mxu0 }
  0xd9   :  { %v397_v12 = vadd.f32 %v396_v54, %v376_v46 }
  0xdb   :  { %v487_v61 = vpop.f32.mrf.mxu2  ;;  %v417_v14 = vadd.f32 %v416_v58, %v397_v12 }
  0xdc   :  { %v488_v5 = vadd.f32 %v487_v61, %v468_v63 }
  0xdd   :  { %v437_v16 = vadd.f32 %v436_v50, %v417_v14 }
  0xee   :  { %v507_v1 = vpop.f32.mrf.mxu0 }
  0xef   :  { %v508_v6 = vadd.f32 %v507_v1, %v488_v5  ;;  %v527_v9 = vpop.f32.mrf.mxu1 }
  0xf1   :  { %v528_v10 = vadd.f32 %v527_v9, %v508_v6 }
  0xf3   :  { %v616_v11 = vadd.f32 %v612_v8, %v528_v10 }
  0xf5   :  { %v618_v13 = vmax.f32 %v616_v11, 0.0  ;;  %v547_v15 = vpop.f32.mrf.mxu3 }
  0xf6   :  { %v548_v18 = vadd.f32 %v547_v15, %v437_v16 }
  0xf7   :  { %672 = vmatmul.f32.vlgmr.msrb.gmra.mxu3 %v618_v13  ;;  %v567_v19 = vpop.f32.mrf.mxu1 }
  0xf8   :  { %v568_v20 = vadd.f32 %v567_v19, %v548_v18 }
  0xfd   :  { %v587_v17 = vpop.f32.mrf.mxu2 }
  0xfe   :  { %v588_v3 = vadd.f32 %v587_v17, %v568_v20 }
 0x105   :  { %v607_v21 = vpop.f32.mrf.mxu2 }
 0x106   :  { %v608_v22 = vadd.f32 %v607_v21, %v588_v3 }
 0x108   :  { %v617_v23 = vadd.f32 %v613_v7, %v608_v22 }
 0x10a   :  { %v619_v24 = vmax.f32 %v617_v23, 0.0 }
 0x10c   :  { %692 = vmatmul.f32.vlgmr.msrb.gmra.mxu0 %v619_v24 }
 0x17a   :  { %v673_v34 = vpop.f32.mrf.mxu3 }
 0x17b   :  { %v674_v35 = vadd.f32 %v762_v33, %v673_v34 }
 0x189   :  { %v693_v0 = vpop.f32.mrf.mxu0 }
 0x18a   :  { %v694_v36 = vadd.f32 %v693_v0, %v674_v35 }
 0x18c   :  { %v696_v37 = vmax.f32 %v694_v36, 0.0 }
 0x18e   :  { %756 = vmatmul.msk.f32.vlgmr.msra.gmra.mxu1 %vm709_vm1, %v696_v37 }
 0x20b   :  { %v730_v39 = vpop.f32.mrf.mxu1 }
 0x20c   :  { %v731_v40 = vadd.f32 %v763_v38, %v730_v39 }
 0x20e   :  { %733 = vst [vmem:[#allocation7] sm:$0x3] %v731_v40 }
 0x20f   :  { %744 = dma.vmem_to_hbm [thread:$0]  %s740_s10, 32, %s742_s12, [#allocation4]  }
 0x210   :  { %840 = dma.done.wait [#allocation4], 32  }
 0x211   :  { %841 = vsyncadd [#allocation4], 4294967264 }
 0x212   :  { %749 = vsyncpa [#allocation3], 1 }
 0x213   :  { %750 = vsyncpa [#allocation6], 1 }
 0x214   :  { %751 = vsyncpa [#allocation4], 1 }

</bundles_post_ra>
